<compile_context>
chip_gen: v6e
topology: v6e:2x2x1
jax: 0.10.0
libtpu: 0.0.40
codegen_flags: <defaults>
</compile_context>

<pallas_src>
import math

import jax
import jax.numpy as jnp
from jax import lax
from jax.experimental import pallas as pl
from jax.experimental.pallas import tpu as pltpu

LANES = 128
SUBLANES = 8
MAX_TILE_ROWS = 4096   # (4096, 128) f32 block = 2 MiB per input per buffer
CHUNK_ROWS = 256       # in-kernel accumulation chunk (bounded VMEM temp)


def _ceil_div(a, b):
    return -(-a // b)


def _num_tensorcores():
    """2 only on v7x (2 TensorCores/chip); v5e/v6e are single-TC."""
    try:
        kind = jax.devices()[0].device_kind.lower()
    except Exception:
        return 1
    return 2 if ("v7" in kind or "7x" in kind) else 1


def _loss_values(x, y, inv_alpha):
    """Elementwise BCEBlurWithLogits loss (before the mean)."""
    x = x.astype(jnp.float32)
    y = y.astype(jnp.float32)
    # Numerically stable BCEWithLogits (reduction='none'):
    #   loss = max(x, 0) - x*y + log1p(exp(-|x|))
    e = jnp.exp(-jnp.abs(x))                      # shared with sigmoid below
    loss = jnp.maximum(x, 0.0) - x * y + jnp.log1p(e)
    # sigmoid(x) from the same e (exact divide; approx reciprocal error would
    # be amplified by inv_alpha inside the blur exp):
    #   x>=0 -> 1/(1+e),   x<0 -> e/(1+e)
    p = jnp.where(x >= 0.0, 1.0, e) / (1.0 + e)
    # Blur factor: 1 - exp((p - y - 1) / (alpha + 1e-4))
    return loss * (1.0 - jnp.exp((p - y - 1.0) * inv_alpha))


def _loss_sum_xla(x, y, inv_alpha):
    return jnp.sum(_loss_values(x, y, inv_alpha))


def _make_kernel(alpha, num_cores, num_tiles, tiles_per_core, tile_rows,
                 last_valid_rows):
    inv_alpha = 1.0 / (alpha + 1e-4)
    tail_is_full = (last_valid_rows == tile_rows)
    has_dead = (num_cores * tiles_per_core != num_tiles)

    chunk_rows = min(CHUNK_ROWS, tile_rows)
    n_full = tile_rows // chunk_rows
    rem_rows = tile_rows - n_full * chunk_rows

    def _chunk(pred_ref, true_ref, acc_ref, row_off, nrows, masked):
        x = pred_ref[pl.ds(row_off, nrows), :]
        y = true_ref[pl.ds(row_off, nrows), :]
        vals = _loss_values(x, y, inv_alpha)
        if masked:
            # Last tile may extend past the array: OOB rows hold unspecified
            # data.  Keep this a select (not a multiply) so garbage/NaN in the
            # masked lanes cannot propagate.
            ridx = row_off + lax.broadcasted_iota(jnp.int32, vals.shape, 0)
            vals = jnp.where(ridx < last_valid_rows, vals, 0.0)
        # (nrows, 128) -> (nrows//8, 8, 128) -> sum over leading dim:
        # pure VPU vreg adds into the resident accumulator.
        acc_ref[...] += vals.reshape(-1, SUBLANES, LANES).sum(axis=0)

    def _do_tile(pred_ref, true_ref, acc_ref, masked):
        if n_full > 1:
            def body(j, carry):
                off = pl.multiple_of(j * chunk_rows, chunk_rows)
                _chunk(pred_ref, true_ref, acc_ref, off, chunk_rows, masked)
                return carry
            lax.fori_loop(0, n_full, body, 0)
        elif n_full == 1:
            _chunk(pred_ref, true_ref, acc_ref, 0, chunk_rows, masked)
        if rem_rows > 0:
            _chunk(pred_ref, true_ref, acc_ref, n_full * chunk_rows,
                   rem_rows, masked)

    def kernel(pred_ref, true_ref, out_ref, acc_ref):
        i = pl.program_id(1)                         # reduction axis (last)
        t = pl.program_id(0) * tiles_per_core + i    # global tile index

        @pl.when(i == 0)
        def _():
            acc_ref[...] = jnp.zeros_like(acc_ref)

        if tail_is_full:
            if has_dead:
                @pl.when(t < num_tiles)
                def _():
                    _do_tile(pred_ref, true_ref, acc_ref, False)
            else:
                _do_tile(pred_ref, true_ref, acc_ref, False)
        else:
            @pl.when(t < num_tiles - 1)
            def _():
                _do_tile(pred_ref, true_ref, acc_ref, False)

            @pl.when(t == num_tiles - 1)
            def _():
                _do_tile(pred_ref, true_ref, acc_ref, True)

        # t >= num_tiles: dead iteration on this core, contributes nothing.

        @pl.when(i == tiles_per_core - 1)
        def _():
            # Single cross-lane/sublane reduction per core.
            out_ref[...] = jnp.sum(acc_ref[...], keepdims=True)

    return kernel


def bce_blur_with_logits_loss(pred, true, alpha: float = 0.05):
    assert pred.shape == true.shape
    n = int(math.prod(pred.shape))
    assert n > 0
    alpha = float(alpha)
    inv_alpha = 1.0 / (alpha + 1e-4)

    # Flatten row-major; keep native dtype (cast happens inside the kernel).
    flat_pred = jnp.ravel(pred)
    flat_true = jnp.ravel(true)

    # Sublane granularity for the narrowest input dtype (8 rows for 4-byte,
    # 16 for bf16, 32 for int8) so block shapes respect native packing.
    sub_rows = SUBLANES
    for dt in (pred.dtype, true.dtype):
        sub_rows = max(sub_rows, 32 // max(1, jnp.dtype(dt).itemsize))
    vreg_elems = sub_rows * LANES

    bulk = (n // vreg_elems) * vreg_elems
    tail = n - bulk

    # Sub-vreg remainder: tiny XLA-side sum instead of jnp.pad'ing (and thereby
    # re-materializing) the whole input through HBM.
    tail_sum = jnp.float32(0.0)
    if tail > 0:
        tail_sum = _loss_sum_xla(flat_pred[bulk:], flat_true[bulk:], inv_alpha)

    if bulk == 0:
        # Input smaller than one vreg: fully covered by the XLA path above.
        return tail_sum * (1.0 / n)

    rows = bulk // LANES                      # multiple of sub_rows
    pred2d = (flat_pred if tail == 0 else flat_pred[:bulk]).reshape(rows, LANES)
    true2d = (flat_true if tail == 0 else flat_true[:bulk]).reshape(rows, LANES)

    tile_rows = min(MAX_TILE_ROWS, rows)      # multiple of sub_rows
    num_tiles = _ceil_div(rows, tile_rows)
    last_valid_rows = rows - (num_tiles - 1) * tile_rows

    num_cores = min(_num_tensorcores(), num_tiles)

    def _run(nc):
        tiles_per_core = _ceil_div(num_tiles, nc)
        kernel = _make_kernel(alpha, nc, num_tiles, tiles_per_core,
                              tile_rows, last_valid_rows)

        def in_index_map(c, i):
            # Clamp dead iterations (t >= num_tiles) onto the last real tile;
            # their contribution is skipped inside the kernel via pl.when.
            t = c * tiles_per_core + i
            return (jnp.minimum(t, num_tiles - 1), 0)

        lead_sem = pltpu.CORE_PARALLEL if nc > 1 else pltpu.ARBITRARY
        return pl.pallas_call(
            kernel,
            out_shape=jax.ShapeDtypeStruct((nc, 1), jnp.float32),
            grid_spec=pltpu.PrefetchScalarGridSpec(
                num_scalar_prefetch=0,
                grid=(nc, tiles_per_core),
                in_specs=[
                    pl.BlockSpec((tile_rows, LANES), in_index_map),
                    pl.BlockSpec((tile_rows, LANES), in_index_map),
                ],
                out_specs=pl.BlockSpec((1, 1), lambda c, i: (c, 0)),
                scratch_shapes=[pltpu.VMEM((SUBLANES, LANES), jnp.float32)],
            ),
            compiler_params=pltpu.CompilerParams(
                dimension_semantics=(lead_sem, pltpu.ARBITRARY),
                vmem_limit_bytes=32 * 1024 * 1024,
            ),
        )(pred2d, true2d)

    if num_cores > 1:
        try:
            partials = _run(num_cores)     # v7x: shard tiles across both TCs
        except Exception:
            partials = _run(1)             # core-parallel lowering unavailable
    else:
        partials = _run(1)                 # single-TC v5e/v6e (or num_tiles==1)

    return (jnp.sum(partials) + tail_sum) * (1.0 / n)


def _reference(pred, true, alpha=0.05):
    x = pred.astype(jnp.float32)
    y = true.astype(jnp.float32)
    loss = jnp.maximum(x, 0.0) - x * y + jnp.log1p(jnp.exp(-jnp.abs(x)))
    p = jax.nn.sigmoid(x)
    alpha_factor = 1.0 - jnp.exp((p - y - 1.0) / (alpha + 1e-4))
    return jnp.mean(loss * alpha_factor)


if __name__ == "__main__":
    key = jax.random.PRNGKey(0)
    k1, k2 = jax.random.split(key)
    # NCHW-shaped logits / targets, as the PyTorch module would receive.
    pred = jax.random.normal(k1, (2, 4, 16, 16), dtype=jnp.float32)
    true = (jax.random.uniform(k2, (2, 4, 16, 16)) > 0.5).astype(jnp.float32)

    out = bce_blur_with_logits_loss(pred, true, alpha=0.05)
    out = jax.block_until_ready(out)

    ref = _reference(pred, true, alpha=0.05)
    assert jnp.allclose(out, ref, rtol=1e-4, atol=1e-6), (out, ref)
    print("KERNEL_OK")
</pallas_src>

<mosaic_0001>
module attributes {stable_mosaic.version = 11 : i64} {
  func.func @kernel(%arg0: i32, %arg1: i32, %arg2: memref<16x128xf32, #tpu.memory_space<vmem>>, %arg3: memref<16x128xf32, #tpu.memory_space<vmem>>, %arg4: memref<1x1xf32, #tpu.memory_space<vmem>>, %arg5: memref<8x128xf32, #tpu.memory_space<vmem>>) attributes {dimension_semantics = [#tpu.dimension_semantics<arbitrary>, #tpu.dimension_semantics<arbitrary>], iteration_bounds = array<i64: 1, 1>, scalar_prefetch = 0 : i64, scratch_operands = 1 : i64, tpu.core_type = #tpu.core_type<tc>, window_params = [{transform_indices = @transform_0, window_bounds = array<i64: 16, 128>}, {transform_indices = @transform_1, window_bounds = array<i64: 16, 128>}, {transform_indices = @transform_2, window_bounds = array<i64: 1, 1>}]} {
    %c0_i32 = arith.constant 0 : i32
    %0 = arith.cmpi eq, %arg1, %c0_i32 : i32
    %1 = arith.extui %0 : i1 to i32
    %c0_i32_0 = arith.constant 0 : i32
    %2 = arith.cmpi ne, %1, %c0_i32_0 : i32
    scf.if %2 {
      %cst_18 = arith.constant 0.000000e+00 : f32
      %39 = vector.broadcast %cst_18 : f32 to vector<8x128xf32>
      %c0_19 = arith.constant 0 : index
      %c0_20 = arith.constant 0 : index
      %40 = vector.load %arg5[%c0_19, %c0_20] : memref<8x128xf32, #tpu.memory_space<vmem>>, vector<8x128xf32>
      tpu.vector_store %arg5[%c0_19, %c0_20], %39 {strides = array<i32>} : memref<8x128xf32, #tpu.memory_space<vmem>>, vector<8x128xf32>,
    } else {
    }
    %c0 = arith.constant 0 : index
    %c0_1 = arith.constant 0 : index
    %3 = vector.load %arg2[%c0, %c0_1] : memref<16x128xf32, #tpu.memory_space<vmem>>, vector<16x128xf32>
    %c0_2 = arith.constant 0 : index
    %c0_3 = arith.constant 0 : index
    %4 = vector.load %arg3[%c0_2, %c0_3] : memref<16x128xf32, #tpu.memory_space<vmem>>, vector<16x128xf32>
    %5 = math.absf %3 : vector<16x128xf32>
    %cst = arith.constant 0.000000e+00 : f32
    %6 = vector.broadcast %cst : f32 to vector<16x128xf32>
    %7 = arith.subf %6, %5 : vector<16x128xf32>
    %8 = math.exp %7 : vector<16x128xf32>
    %cst_4 = arith.constant 0.000000e+00 : f32
    %9 = vector.broadcast %cst_4 : f32 to vector<16x128xf32>
    %10 = arith.maximumf %3, %9 : vector<16x128xf32>
    %11 = arith.mulf %3, %4 : vector<16x128xf32>
    %12 = arith.subf %10, %11 : vector<16x128xf32>
    %13 = math.log1p %8 : vector<16x128xf32>
    %14 = arith.addf %12, %13 : vector<16x128xf32>
    %cst_5 = arith.constant 0.000000e+00 : f32
    %15 = vector.broadcast %cst_5 : f32 to vector<16x128xf32>
    %16 = arith.cmpf oge, %3, %15 : vector<16x128xf32>
    %cst_6 = arith.constant 1.000000e+00 : f32
    %17 = vector.broadcast %cst_6 : f32 to vector<16x128xf32>
    %18 = arith.select %16, %17, %8 : vector<16x128xi1>, vector<16x128xf32>
    %cst_7 = arith.constant 1.000000e+00 : f32
    %19 = vector.broadcast %cst_7 : f32 to vector<16x128xf32>
    %20 = arith.addf %19, %8 : vector<16x128xf32>
    %21 = arith.divf %18, %20 : vector<16x128xf32>
    %22 = arith.subf %21, %4 : vector<16x128xf32>
    %cst_8 = arith.constant 1.000000e+00 : f32
    %23 = vector.broadcast %cst_8 : f32 to vector<16x128xf32>
    %24 = arith.subf %22, %23 : vector<16x128xf32>
    %cst_9 = arith.constant 19.9600792 : f32
    %25 = vector.broadcast %cst_9 : f32 to vector<16x128xf32>
    %26 = arith.mulf %24, %25 : vector<16x128xf32>
    %27 = math.exp %26 : vector<16x128xf32>
    %cst_10 = arith.constant 1.000000e+00 : f32
    %28 = vector.broadcast %cst_10 : f32 to vector<16x128xf32>
    %29 = arith.subf %28, %27 : vector<16x128xf32>
    %30 = arith.mulf %14, %29 : vector<16x128xf32>
    %c0_11 = arith.constant 0 : index
    %c0_12 = arith.constant 0 : index
    %31 = vector.load %arg5[%c0_11, %c0_12] : memref<8x128xf32, #tpu.memory_space<vmem>>, vector<8x128xf32>
    %32 = vector.shape_cast %30 : vector<16x128xf32> to vector<2x8x128xf32>
    %cst_13 = arith.constant dense<0.000000e+00> : vector<8x128xf32>
    %33 = vector.multi_reduction <add>, %32, %cst_13 [0] : vector<2x8x128xf32> to vector<8x128xf32>
    %34 = arith.addf %31, %33 : vector<8x128xf32>
    %c0_14 = arith.constant 0 : index
    %c0_15 = arith.constant 0 : index
    %35 = vector.load %arg5[%c0_14, %c0_15] : memref<8x128xf32, #tpu.memory_space<vmem>>, vector<8x128xf32>
    tpu.vector_store %arg5[%c0_14, %c0_15], %34 {strides = array<i32>} : memref<8x128xf32, #tpu.memory_space<vmem>>, vector<8x128xf32>,
    %c0_i32_16 = arith.constant 0 : i32
    %36 = arith.cmpi eq, %arg1, %c0_i32_16 : i32
    %37 = arith.extui %36 : i1 to i32
    %c0_i32_17 = arith.constant 0 : i32
    %38 = arith.cmpi ne, %37, %c0_i32_17 : i32
    scf.if %38 {
      %c0_18 = arith.constant 0 : index
      %c0_19 = arith.constant 0 : index
      %39 = vector.load %arg5[%c0_18, %c0_19] : memref<8x128xf32, #tpu.memory_space<vmem>>, vector<8x128xf32>
      %40 = vector.shape_cast %39 : vector<8x128xf32> to vector<1x8x128xf32>
      %cst_20 = arith.constant dense<0.000000e+00> : vector<1xf32>
      %41 = vector.multi_reduction <add>, %40, %cst_20 [1, 2] : vector<1x8x128xf32> to vector<1xf32>
      %42 = vector.shape_cast %41 : vector<1xf32> to vector<1x1x1xf32>
      %43 = vector.extract %42[0, 0, 0] : f32 from vector<1x1x1xf32>
      %44 = vector.broadcast %43 : f32 to vector<1x1xf32>
      %c0_21 = arith.constant 0 : index
      %c0_22 = arith.constant 0 : index
      %45 = vector.load %arg4[%c0_21, %c0_22] : memref<1x1xf32, #tpu.memory_space<vmem>>, vector<1x1xf32>
      tpu.vector_store %arg4[%c0_21, %c0_22], %44 {strides = array<i32>} : memref<1x1xf32, #tpu.memory_space<vmem>>, vector<1x1xf32>,
    } else {
    }
    return
  }
  func.func @transform_0(%arg0: i32, %arg1: i32) -> (i32, i32) {
    %c1_i32 = arith.constant 1 : i32
    %0 = arith.muli %arg0, %c1_i32 : i32
    %1 = arith.addi %0, %arg1 : i32
    %c0_i32 = arith.constant 0 : i32
    %2 = arith.minsi %1, %c0_i32 : i32
    %c0_i32_0 = arith.constant 0 : i32
    %c0_i32_1 = arith.constant 0 : i32
    return %2, %c0_i32_0 : i32, i32
  }
  func.func @transform_1(%arg0: i32, %arg1: i32) -> (i32, i32) {
    %c1_i32 = arith.constant 1 : i32
    %0 = arith.muli %arg0, %c1_i32 : i32
    %1 = arith.addi %0, %arg1 : i32
    %c0_i32 = arith.constant 0 : i32
    %2 = arith.minsi %1, %c0_i32 : i32
    %c0_i32_0 = arith.constant 0 : i32
    %c0_i32_1 = arith.constant 0 : i32
    return %2, %c0_i32_0 : i32, i32
  }
  func.func @transform_2(%arg0: i32, %arg1: i32) -> (i32, i32) {
    %c0_i32 = arith.constant 0 : i32
    %c0_i32_0 = arith.constant 0 : i32
    return %arg0, %c0_i32 : i32, i32
  }
}

</mosaic_0001>

<bundles_post_ra>
// kernel: tpu_custom_call.1
= control target key start
LH: loop header
LB: loop body
LE: loop exit
PB: predicated region body
PF: predicated region fallthrough
CT: control target
= control target key end

     0   :  { %7 = vsyncpa [#allocation4], 0  ;;  %s287_s0 = inlined_call_operand.hbm [shape: f32[16,128], index: 0, kind: input, shape index: {}]   ;;  %s288_s1 = inlined_call_operand.hbm [shape: f32[16,128], index: 1, kind: input, shape index: {}]   ;;  %s289_s2 = inlined_call_operand.hbm [shape: f32[1,1], index: 2, kind: output, shape index: {}]  }
   0x1   :  { %8 = vsyncpa [#allocation7], 0 }
   0x2   :  { %9 = vsyncpa [#allocation5], 0  ;;  %s258_s9 = smov [#allocation3]  }
   0x3   :  { %s21_s10 = sshll.u32 %s258_s9, 4  ;;  %s22_s10 = int_to_ptr.vmem [resolvable:$true] %s21_s10 }
   0x4   :  { %s200_s11 = scalar_lea.vmem %s22_s10, 256  ;;  %p205_p1 = scmp.lt.s32.totalorder %s22_s10, %s22_s10 }
   0x5   :  { %p201_p0 = scmp.ne.s32.totalorder %s22_s10, %s200_s11  ;;  %p206_p2 = scmp.lt.s32.totalorder %s200_s11, %s200_s11 }
   0x7   :  { %p207_p3 = por %p206_p2, %p205_p1 }
   0x9   :  { %p208_p4 = pnand %p207_p3, %p201_p0 }
   0xb   :  { %211 = shalt.err (!%p208_p4)
}
   0xc   :  { %s259_s12 = smov 128   ;;  %s260_s13 = smov 8  }
   0xd   :  { %27 = dma.hbm_to_vmem [thread:$0]  %s287_s0, 256, %s22_s10, [#allocation4], %s259_s12, %s259_s12, %s260_s13  }
   0xe   :  { %s261_s16 = smov [#allocation6]  }
   0xf   :  { %s39_s17 = sshll.u32 %s261_s16, 4  ;;  %s40_s17 = int_to_ptr.vmem [resolvable:$true] %s39_s17 }
  0x10   :  { %s220_s18 = scalar_lea.vmem %s40_s17, 256  ;;  %p225_p6 = scmp.lt.s32.totalorder %s40_s17, %s40_s17 }
  0x11   :  { %p221_p5 = scmp.ne.s32.totalorder %s40_s17, %s220_s18  ;;  %p226_p7 = scmp.lt.s32.totalorder %s220_s18, %s220_s18 }
  0x13   :  { %p227_p8 = por %p226_p7, %p225_p6 }
  0x15   :  { %p228_p9 = pnand %p227_p8, %p221_p5 }
  0x17   :  { %231 = shalt.err (!%p228_p9)
}
  0x18   :  { %45 = dma.hbm_to_vmem [thread:$0]  %s288_s1, 256, %s40_s17, [#allocation7], %s259_s12, %s259_s12, %s260_s13  }
  0x19   :  { %252 = dma.done.wait [#allocation4], 256  }
  0x1a   :  { %253 = vsyncadd [#allocation4], 4294967040 }
  0x1b   :  { %254 = dma.done.wait [#allocation7], 256  }
  0x1c   :  { %255 = vsyncadd [#allocation7], 4294967040  ;;  %v65_v0 = vld [vmem:[#allocation3] sm:$0xff]  ;;  %v66_v1 = vld [vmem:[#allocation3 + $0x8] sm:$0xff]  ;;  %s262_s0 = smov [#allocation8]   ;;  %vm145_vm4 = vcmask 0  }
  0x1d   :  { %v69_v2 = vand.u32 2147483647, %v65_v0  ;;  %v70_v3 = vand.u32 2147483647, %v66_v1  ;;  %vm103_vm0 = vcmp.ge.f32.partialorder %v65_v0, 0.0  ;;  %vm104_vm1 = vcmp.ge.f32.partialorder %v66_v1, 0.0 }
  0x1e   :  { %v67_v15 = vld [vmem:[#allocation6] sm:$0xff]  ;;  %v68_v17 = vld [vmem:[#allocation6 + $0x8] sm:$0xff]  ;;  %v77_v36 = vmax.f32 %v65_v0, 0.0  ;;  %v78_v38 = vmax.f32 %v66_v1, 0.0  ;;  %s153_s1 = sshll.u32 %s262_s0, 4  ;;  %s154_s1 = int_to_ptr.vmem [resolvable:$true] %s153_s1 }
  0x1f   :  { %v71_v4 = vsub.f32 0.0, %v69_v2  ;;  %v72_v5 = vsub.f32 0.0, %v70_v3  ;;  %v79_v37 = vmul.f32 %v67_v15, %v65_v0  ;;  %v80_v39 = vmul.f32 %v68_v17, %v66_v1  ;;  %s232_s22 = scalar_lea.vmem %s154_s1, 16  ;;  %s236_s23 = scalar_lea.vmem %s154_s1, 32 }
  0x20   :  { %p233_p10 = scmp.ne.s32.totalorder %s154_s1, %s232_s22  ;;  %p237_p11 = scmp.lt.s32.totalorder %s154_s1, %s154_s1 }
  0x21   :  { %v73_v6 = vmul.f32 1.442695, %v71_v4  ;;  %v75_v7 = vmul.f32 1.442695, %v72_v5  ;;  %v81_v44 = vsub.f32 %v77_v36, %v79_v37  ;;  %v82_v45 = vsub.f32 %v78_v38, %v80_v39  ;;  %p238_p12 = scmp.lt.s32.totalorder %s236_s23, %s232_s22 }
  0x23   :  { %176 = vpow2.f32 %v73_v6  ;;  %p239_p13 = por %p238_p12, %p237_p11 }
  0x24   :  { %178 = vpow2.f32 %v75_v7 }
  0x25   :  { %p240_p0 = pnand %p239_p13, %p233_p10 }
  0x30   :  { %v177_v8 = vpop.eup %176 }
  0x31   :  { %v179_v9 = vpop.eup %178  ;;  %v83_v10 = vadd.f32 1.0, %v177_v8  ;;  %v105_v12 = vsel %vm103_vm0, 1.0, %v177_v8  ;;  %v86_v25 = vmul.f32 -0.5, %v177_v8  ;;  %v89_v32 = vand.u32 2147483647, %v177_v8 }
  0x32   :  { %v92_v11 = vadd.f32 1.0, %v179_v9  ;;  %v106_v13 = vsel %vm104_vm1, 1.0, %v179_v9  ;;  %v95_v27 = vmul.f32 -0.5, %v179_v9  ;;  %v98_v35 = vand.u32 2147483647, %v179_v9 }
  0x33   :  { %180 = vrcp.f32 %v83_v10  ;;  %v87_v30 = vadd.f32 1.0, %v86_v25  ;;  %vm90_vm2 = vcmp.lt.f32.partialorder %v89_v32, 0.0004427343 }
  0x34   :  { %182 = vrcp.f32 %v92_v11  ;;  %v96_v33 = vadd.f32 1.0, %v95_v27  ;;  %vm99_vm3 = vcmp.lt.f32.partialorder %v98_v35, 0.0004427343 }
  0x35   :  { %184 = vlog2.f32 %v83_v10  ;;  %v88_v41 = vmul.f32 %v177_v8, %v87_v30 }
  0x36   :  { %186 = vlog2.f32 %v92_v11  ;;  %v97_v43 = vmul.f32 %v179_v9, %v96_v33 }
  0x40   :  { %v181_v14 = vpop.eup %180 }
  0x41   :  { %v183_v16 = vpop.eup %182  ;;  %v110_v18 = vmul.f32 %v181_v14, %v105_v12 }
  0x42   :  { %v112_v19 = vmul.f32 %v183_v16, %v106_v13  ;;  %v185_v31 = vpop.eup %184 }
  0x43   :  { %v113_v20 = vsub.f32 %v110_v18, %v67_v15  ;;  %v187_v34 = vpop.eup %186  ;;  %v85_v40 = vmul.f32 0.6931472, %v185_v31 }
  0x44   :  { %v114_v21 = vsub.f32 %v112_v19, %v68_v17  ;;  %v94_v42 = vmul.f32 0.6931472, %v187_v34 }
  0x45   :  { %v167_v22 = vadd.f32 -1.0, %v113_v20  ;;  %v91_v46 = vsel %vm90_vm2, %v88_v41, %v85_v40 }
  0x46   :  { %v168_v23 = vadd.f32 -1.0, %v114_v21  ;;  %v100_v47 = vsel %vm99_vm3, %v97_v43, %v94_v42  ;;  %v101_v48 = vadd.f32 %v91_v46, %v81_v44 }
  0x47   :  { %v117_v24 = vmul.f32 19.96008, %v167_v22  ;;  %v102_v50 = vadd.f32 %v100_v47, %v82_v45 }
  0x48   :  { %v118_v26 = vmul.f32 19.96008, %v168_v23 }
  0x49   :  { %v119_v28 = vmul.f32 1.442695, %v117_v24 }
  0x4a   :  { %v121_v29 = vmul.f32 1.442695, %v118_v26 }
  0x4b   :  { %188 = vpow2.f32 %v119_v28 }
  0x4c   :  { %190 = vpow2.f32 %v121_v29 }
  0x58   :  { %v189_v49 = vpop.eup %188 }
  0x59   :  { %v191_v51 = vpop.eup %190  ;;  %v123_v52 = vsub.f32 1.0, %v189_v49 }
  0x5a   :  { %v124_v53 = vsub.f32 1.0, %v191_v51 }
  0x5b   :  { %v125_v54 = vmul.f32 %v123_v52, %v101_v48 }
  0x5c   :  { %v126_v55 = vmul.f32 %v124_v53, %v102_v50 }
  0x5e   :  { %v128_v56 = vadd.f32 %v126_v55, %v125_v54 }
  0x60   :  { %135 = vadd.xlane.f32.xlu0 %v128_v56 }
  0xe9   :  { %v136_v57 = vpop.xlane.xlu0 %135 }
  0xea   :  { %v137_v58 = vrot.slane %v136_v57, 4 }
  0xec   :  { %v138_v59 = vadd.f32 %v137_v58, %v136_v57 }
  0xee   :  { %v139_v60 = vrot.slane %v138_v59, 2 }
  0xf0   :  { %v140_v61 = vadd.f32 %v139_v60, %v138_v59 }
  0xf2   :  { %v141_v62 = vrot.slane %v140_v61, 1 }
  0xf4   :  { %v142_v63 = vadd.f32 %v141_v62, %v140_v61 }
  0xf6   :  { %169 = vpush %v142_v63 }
 0x127   :  { %s170_s21 = spop %169 }
 0x128   :  { %v144_v0 = vstv %s170_s21 }
 0x129   :  { %146 = vst.msk [vmem:[#allocation8] sm:$0x1] %vm145_vm4, %v144_v0 }
 0x12a   :  { %243 = shalt.err (!%p240_p0)
}
 0x12b   :  { %156 = dma.vmem_to_hbm [thread:$0]  %s154_s1, 16, %s289_s2, [#allocation5]  }
 0x12c   :  { %256 = dma.done.wait [#allocation5], 16  }
 0x12d   :  { %257 = vsyncadd [#allocation5], 4294967280 }
 0x12e   :  { %160 = vsyncpa [#allocation4], 1 }
 0x12f   :  { %161 = vsyncpa [#allocation7], 1 }
 0x130   :  { %162 = vsyncpa [#allocation5], 1 }

</bundles_post_ra>
